<compile_context>
chip_gen: v7x
topology: tpu7x:2x2x1
jax: 0.10.0
libtpu: 0.0.40
codegen_flags: <defaults>
</compile_context>

<pallas_src>
import functools

import jax
import jax.numpy as jnp
from jax import lax
from jax.experimental import pallas as pl
from jax.experimental.pallas import tpu as pltpu


def _vpe_gather_kernel(ids_smem, w_hbm, out_ref, sems, *,
                       vocab_size, tokens_per_block, rows_per_chunk):
    """Gather `tokens_per_block` embedding rows straight into the output tile.

    ids_smem : (n_pad,) int32 in SMEM (scalar-prefetched flattened token ids)
    w_hbm    : (V, H)   weight table, left in HBM (memory_space=pl.ANY)
    out_ref  : (TN, H)  output tile in VMEM (lane-dense along H); DMA target
    sems     : (2,)     shared DMA semaphores (one per in-flight sub-chunk)
    """
    H = out_ref.shape[1]
    i = pl.program_id(0)
    base = i * tokens_per_block
    num_chunks = tokens_per_block // rows_per_chunk

    zero_row = jnp.zeros((1, H), dtype=out_ref.dtype)   # hoisted out of loops

    def issue_chunk(c):  # c is a static Python int (chunk-level loop is static)
        sem = sems.at[c % 2]

        def body(j, carry):
            row = c * rows_per_chunk + j
            tok = ids_smem[base + row]
            in_range = jnp.logical_and(tok >= 0, tok < vocab_size)
            safe = jnp.where(in_range, tok, 0)           # clamp; zeroed later
            pltpu.make_async_copy(
                w_hbm.at[pl.ds(safe, 1), :],             # (1, H) HBM row
                out_ref.at[pl.ds(row, 1), :],            # gather directly into out
                sem,
            ).start()
            return carry

        lax.fori_loop(0, rows_per_chunk, body, 0)

    def wait_chunk(c):
        # One aggregate wait: descriptor byte count equals the sum of the
        # rows_per_chunk row DMAs issued on this chunk's semaphore.
        pltpu.make_async_copy(
            w_hbm.at[pl.ds(0, rows_per_chunk), :],
            out_ref.at[pl.ds(c * rows_per_chunk, rows_per_chunk), :],
            sems.at[c % 2],
        ).wait()

    def mask_chunk(c):
        # Zero the (rare) rows whose ids are outside [0, V): padding sentinels
        # and out-of-range ids. This matches the summed-over-ranks TP semantics.
        def body(j, carry):
            row = c * rows_per_chunk + j
            tok = ids_smem[base + row]
            out_of_range = jnp.logical_or(tok < 0, tok >= vocab_size)

            @pl.when(out_of_range)
            def _():
                out_ref[pl.ds(row, 1), :] = zero_row

            return carry

        lax.fori_loop(0, rows_per_chunk, body, 0)

    # Intra-step software pipeline over sub-chunks: chunk c+1's gathers are in
    # flight while chunk c is waited on / masked.
    issue_chunk(0)
    for c in range(num_chunks):          # static, small (<= 4 iterations)
        if c + 1 < num_chunks:
            issue_chunk(c + 1)
        wait_chunk(c)
        mask_chunk(c)


def vocab_parallel_embedding(ids, weight, world_size, *,
                             tokens_per_block=None,
                             num_chunks=4,
                             max_tokens_per_call=32768):
    """ids: int array of any shape; weight: (V, H). Returns ids.shape + (H,)."""
    V, H = weight.shape
    assert V % world_size == 0, "vocab size must be divisible by world_size"
    # NOTE: for best store throughput H should be a multiple of 128 (lane-dense
    # output). We do not pad the weight table here (that would copy V*H bytes).

    orig_shape = tuple(ids.shape)
    N = int(ids.size)
    itemsize = jnp.dtype(weight.dtype).itemsize
    sublane_pack = max(8, 32 // itemsize)         # 8 f32, 16 bf16, 32 int8/fp8

    # Pick the token tile: large (amortizes per-step overhead, keeps many row
    # DMAs in flight) but capped so the double-buffered output tile fits
    # comfortably inside scoped VMEM (v7x default is 32 MiB of 64 MiB physical).
    tn = tokens_per_block if tokens_per_block is not None else 256
    tn = max(sublane_pack, (tn // sublane_pack) * sublane_pack)
    while tn > sublane_pack and 2 * tn * H * itemsize > (16 << 20):
        tn = max(sublane_pack, tn // 2)
    # Keep the aggregate-wait dummy descriptor (rows_per_chunk rows of the
    # weight table) in bounds for tiny vocab shards.
    num_chunks = max(1, min(num_chunks, tn))
    while tn % num_chunks != 0:
        num_chunks -= 1
    while tn > sublane_pack and tn // num_chunks > V:
        tn = max(sublane_pack, tn // 2)
    rows_per_chunk = tn // num_chunks

    vmem_limit = int(min(max(2 * tn * H * itemsize + (4 << 20), 32 << 20), 60 << 20))

    ids_flat = ids.reshape(N).astype(jnp.int32)
    n_pad = pl.cdiv(N, tn) * tn
    if n_pad != N:
        # Pad with an out-of-range sentinel id -> zero rows, sliced away below.
        ids_flat = jnp.pad(ids_flat, (0, n_pad - N), constant_values=V)

    kernel = functools.partial(
        _vpe_gather_kernel, vocab_size=V,
        tokens_per_block=tn, rows_per_chunk=rows_per_chunk)

    def run(ids_chunk):
        n = ids_chunk.shape[0]
        return pl.pallas_call(
            kernel,
            out_shape=jax.ShapeDtypeStruct((n, H), weight.dtype),
            grid_spec=pltpu.PrefetchScalarGridSpec(
                num_scalar_prefetch=1,                        # ids -> SMEM
                grid=(n // tn,),
                in_specs=[pl.BlockSpec(memory_space=pl.ANY)], # weight stays in HBM
                out_specs=pl.BlockSpec((tn, H), lambda i, ids_sref: (i, 0)),
                scratch_shapes=[pltpu.SemaphoreType.DMA((2,))],
            ),
            compiler_params=pltpu.CompilerParams(
                dimension_semantics=("parallel",),            # shards across TCs (v7x)
                vmem_limit_bytes=vmem_limit),
        )(ids_chunk, weight)

    # SMEM capacity guard: the whole ids array is scalar-prefetched into SMEM,
    # so very long token streams are split across multiple pallas_calls.
    call_cap = max(tn, (max_tokens_per_call // tn) * tn)
    if n_pad <= call_cap:
        out = run(ids_flat)
    else:
        pieces = [run(ids_flat[s:s + call_cap]) for s in range(0, n_pad, call_cap)]
        out = jnp.concatenate(pieces, axis=0)

    return out[:N].reshape(orig_shape + (H,))


if __name__ == "__main__":
    B, S = 2, 8            # batch, sequence
    V, H = 64, 128         # total vocab, hidden size (lane-dense H)
    WORLD_SIZE = 2         # simulated tensor-parallel degree

    key = jax.random.PRNGKey(0)
    k_w, k_ids = jax.random.split(key)
    weight = jax.random.normal(k_w, (V, H), dtype=jnp.float32)
    ids = jax.random.randint(k_ids, (B, S), 0, V, dtype=jnp.int32)

    out = vocab_parallel_embedding(ids, weight, WORLD_SIZE)
    out = jax.block_until_ready(out)

    # Reference: sum over simulated ranks of masked partial lookups == gather.
    ref = weight[ids]
    assert out.shape == (B, S, H)
    assert jnp.allclose(out, ref, atol=0.0, rtol=0.0), "mismatch vs reference"

    print("KERNEL_OK")
</pallas_src>

<mosaic_0001>
module attributes {stable_mosaic.version = 11 : i64} {
  func.func @_vpe_gather_kernel(%arg0: i32, %arg1: memref<256xi32, #tpu.memory_space<smem>>, %arg2: memref<64x128xf32, #tpu.memory_space<any>>, %arg3: memref<256x128xf32, #tpu.memory_space<vmem>>, %arg4: memref<2x!tpu.dma_semaphore, #tpu.memory_space<semaphore_mem>>) attributes {dimension_semantics = [#tpu.dimension_semantics<parallel>], iteration_bounds = array<i64: 1>, scalar_prefetch = 1 : i64, scratch_operands = 1 : i64, tpu.core_type = #tpu.core_type<tc>, window_params = [{}, {transform_indices = @transform_1, window_bounds = array<i64: 256, 128>}]} {
    %c256_i32 = arith.constant 256 : i32
    %0 = arith.muli %arg0, %c256_i32 : i32
    %cst = arith.constant 0.000000e+00 : f32
    %1 = vector.broadcast %cst : f32 to vector<1x128xf32>
    %c0_i32 = arith.constant 0 : i32
    %c0_i32_0 = arith.constant 0 : i32
    %c64_i32 = arith.constant 64 : i32
    %2 = arith.addi %c0_i32_0, %c64_i32 : i32
    %c1_i32 = arith.constant 1 : i32
    scf.for %arg5 = %c0_i32_0 to %2 step %c1_i32  : i32 {
      %c0_i32_51 = arith.constant 0 : i32
      %26 = arith.addi %c0_i32_51, %arg5 : i32
      %27 = arith.addi %0, %26 : i32
      %28 = arith.index_cast %27 : i32 to index
      %29 = memref.load %arg1[%28] : memref<256xi32, #tpu.memory_space<smem>>
      %c0_i32_52 = arith.constant 0 : i32
      %30 = arith.cmpi sge, %29, %c0_i32_52 : i32
      %c64_i32_53 = arith.constant 64 : i32
      %31 = arith.cmpi slt, %29, %c64_i32_53 : i32
      %32 = arith.andi %30, %31 : i1
      %c0_i32_54 = arith.constant 0 : i32
      %33 = arith.select %32, %29, %c0_i32_54 : i32
      %c0_i32_55 = arith.constant 0 : i32
      %34 = tpu.memref_slice %arg2[%33, %c0_i32_55] : memref<64x128xf32, #tpu.memory_space<any>> -> memref<1x128xf32, #tpu.memory_space<any>>
      %c0_i32_56 = arith.constant 0 : i32
      %35 = tpu.memref_slice %arg3[%26, %c0_i32_56] : memref<256x128xf32, #tpu.memory_space<vmem>> -> memref<1x128xf32, #tpu.memory_space<vmem>>
      %36 = tpu.memref_slice %arg4[%c0_i32] : memref<2x!tpu.dma_semaphore, #tpu.memory_space<semaphore_mem>> -> memref<1x!tpu.dma_semaphore, #tpu.memory_space<semaphore_mem>>
      %37 = tpu.memref_squeeze %36 : memref<1x!tpu.dma_semaphore, #tpu.memory_space<semaphore_mem>> -> memref<!tpu.dma_semaphore, #tpu.memory_space<semaphore_mem>>
      tpu.enqueue_dma source(%34 : memref<1x128xf32, #tpu.memory_space<any>>) target(%35 : memref<1x128xf32, #tpu.memory_space<vmem>>) target_semaphore(%37 : memref<!tpu.dma_semaphore, #tpu.memory_space<semaphore_mem>>)
    }
    %c64_i32_1 = arith.constant 64 : i32
    %c1_i32_2 = arith.constant 1 : i32
    %c0_i32_3 = arith.constant 0 : i32
    %c64_i32_4 = arith.constant 64 : i32
    %3 = arith.addi %c0_i32_3, %c64_i32_4 : i32
    %c1_i32_5 = arith.constant 1 : i32
    scf.for %arg5 = %c0_i32_3 to %3 step %c1_i32_5  : i32 {
      %c64_i32_51 = arith.constant 64 : i32
      %26 = arith.addi %c64_i32_51, %arg5 : i32
      %27 = arith.addi %0, %26 : i32
      %28 = arith.index_cast %27 : i32 to index
      %29 = memref.load %arg1[%28] : memref<256xi32, #tpu.memory_space<smem>>
      %c0_i32_52 = arith.constant 0 : i32
      %30 = arith.cmpi sge, %29, %c0_i32_52 : i32
      %c64_i32_53 = arith.constant 64 : i32
      %31 = arith.cmpi slt, %29, %c64_i32_53 : i32
      %32 = arith.andi %30, %31 : i1
      %c0_i32_54 = arith.constant 0 : i32
      %33 = arith.select %32, %29, %c0_i32_54 : i32
      %c0_i32_55 = arith.constant 0 : i32
      %34 = tpu.memref_slice %arg2[%33, %c0_i32_55] : memref<64x128xf32, #tpu.memory_space<any>> -> memref<1x128xf32, #tpu.memory_space<any>>
      %c0_i32_56 = arith.constant 0 : i32
      %35 = tpu.memref_slice %arg3[%26, %c0_i32_56] : memref<256x128xf32, #tpu.memory_space<vmem>> -> memref<1x128xf32, #tpu.memory_space<vmem>>
      %36 = tpu.memref_slice %arg4[%c1_i32_2] : memref<2x!tpu.dma_semaphore, #tpu.memory_space<semaphore_mem>> -> memref<1x!tpu.dma_semaphore, #tpu.memory_space<semaphore_mem>>
      %37 = tpu.memref_squeeze %36 : memref<1x!tpu.dma_semaphore, #tpu.memory_space<semaphore_mem>> -> memref<!tpu.dma_semaphore, #tpu.memory_space<semaphore_mem>>
      tpu.enqueue_dma source(%34 : memref<1x128xf32, #tpu.memory_space<any>>) target(%35 : memref<1x128xf32, #tpu.memory_space<vmem>>) target_semaphore(%37 : memref<!tpu.dma_semaphore, #tpu.memory_space<semaphore_mem>>)
    }
    %c64_i32_6 = arith.constant 64 : i32
    %c0_i32_7 = arith.constant 0 : i32
    %c0_i32_8 = arith.constant 0 : i32
    %c0_i32_9 = arith.constant 0 : i32
    %4 = tpu.memref_slice %arg2[%c0_i32_8, %c0_i32_9] : memref<64x128xf32, #tpu.memory_space<any>> -> memref<64x128xf32, #tpu.memory_space<any>>
    %c0_i32_10 = arith.constant 0 : i32
    %c0_i32_11 = arith.constant 0 : i32
    %5 = tpu.memref_slice %arg3[%c0_i32_10, %c0_i32_11] : memref<256x128xf32, #tpu.memory_space<vmem>> -> memref<64x128xf32, #tpu.memory_space<vmem>>
    %6 = tpu.memref_slice %arg4[%c0_i32_7] : memref<2x!tpu.dma_semaphore, #tpu.memory_space<semaphore_mem>> -> memref<1x!tpu.dma_semaphore, #tpu.memory_space<semaphore_mem>>
    %7 = tpu.memref_squeeze %6 : memref<1x!tpu.dma_semaphore, #tpu.memory_space<semaphore_mem>> -> memref<!tpu.dma_semaphore, #tpu.memory_space<semaphore_mem>>
    tpu.wait_dma2 semaphore(%7 : memref<!tpu.dma_semaphore, #tpu.memory_space<semaphore_mem>>) src(%4 : memref<64x128xf32, #tpu.memory_space<any>>) dst(%5 : memref<64x128xf32, #tpu.memory_space<vmem>>)
    %c0_i32_12 = arith.constant 0 : i32
    %c64_i32_13 = arith.constant 64 : i32
    %8 = arith.addi %c0_i32_12, %c64_i32_13 : i32
    %c1_i32_14 = arith.constant 1 : i32
    scf.for %arg5 = %c0_i32_12 to %8 step %c1_i32_14  : i32 {
      %c0_i32_51 = arith.constant 0 : i32
      %26 = arith.addi %c0_i32_51, %arg5 : i32
      %27 = arith.addi %0, %26 : i32
      %28 = arith.index_cast %27 : i32 to index
      %29 = memref.load %arg1[%28] : memref<256xi32, #tpu.memory_space<smem>>
      %c0_i32_52 = arith.constant 0 : i32
      %30 = arith.cmpi slt, %29, %c0_i32_52 : i32
      %c64_i32_53 = arith.constant 64 : i32
      %31 = arith.cmpi sge, %29, %c64_i32_53 : i32
      %32 = arith.ori %30, %31 : i1
      %33 = arith.extui %32 : i1 to i32
      %c0_i32_54 = arith.constant 0 : i32
      %34 = arith.cmpi ne, %33, %c0_i32_54 : i32
      scf.if %34 {
        %35 = arith.index_cast %26 : i32 to index
        %c0 = arith.constant 0 : index
        %36 = vector.load %arg3[%35, %c0] : memref<256x128xf32, #tpu.memory_space<vmem>>, vector<1x128xf32>
        tpu.vector_store %arg3[%35, %c0], %1 {strides = array<i32>} : memref<256x128xf32, #tpu.memory_space<vmem>>, vector<1x128xf32>,
      } else {
      }
    }
    %c64_i32_15 = arith.constant 64 : i32
    %c0_i32_16 = arith.constant 0 : i32
    %c0_i32_17 = arith.constant 0 : i32
    %c64_i32_18 = arith.constant 64 : i32
    %9 = arith.addi %c0_i32_17, %c64_i32_18 : i32
    %c1_i32_19 = arith.constant 1 : i32
    scf.for %arg5 = %c0_i32_17 to %9 step %c1_i32_19  : i32 {
      %c128_i32_51 = arith.constant 128 : i32
      %26 = arith.addi %c128_i32_51, %arg5 : i32
      %27 = arith.addi %0, %26 : i32
      %28 = arith.index_cast %27 : i32 to index
      %29 = memref.load %arg1[%28] : memref<256xi32, #tpu.memory_space<smem>>
      %c0_i32_52 = arith.constant 0 : i32
      %30 = arith.cmpi sge, %29, %c0_i32_52 : i32
      %c64_i32_53 = arith.constant 64 : i32
      %31 = arith.cmpi slt, %29, %c64_i32_53 : i32
      %32 = arith.andi %30, %31 : i1
      %c0_i32_54 = arith.constant 0 : i32
      %33 = arith.select %32, %29, %c0_i32_54 : i32
      %c0_i32_55 = arith.constant 0 : i32
      %34 = tpu.memref_slice %arg2[%33, %c0_i32_55] : memref<64x128xf32, #tpu.memory_space<any>> -> memref<1x128xf32, #tpu.memory_space<any>>
      %c0_i32_56 = arith.constant 0 : i32
      %35 = tpu.memref_slice %arg3[%26, %c0_i32_56] : memref<256x128xf32, #tpu.memory_space<vmem>> -> memref<1x128xf32, #tpu.memory_space<vmem>>
      %36 = tpu.memref_slice %arg4[%c0_i32_16] : memref<2x!tpu.dma_semaphore, #tpu.memory_space<semaphore_mem>> -> memref<1x!tpu.dma_semaphore, #tpu.memory_space<semaphore_mem>>
      %37 = tpu.memref_squeeze %36 : memref<1x!tpu.dma_semaphore, #tpu.memory_space<semaphore_mem>> -> memref<!tpu.dma_semaphore, #tpu.memory_space<semaphore_mem>>
      tpu.enqueue_dma source(%34 : memref<1x128xf32, #tpu.memory_space<any>>) target(%35 : memref<1x128xf32, #tpu.memory_space<vmem>>) target_semaphore(%37 : memref<!tpu.dma_semaphore, #tpu.memory_space<semaphore_mem>>)
    }
    %c64_i32_20 = arith.constant 64 : i32
    %c1_i32_21 = arith.constant 1 : i32
    %c0_i32_22 = arith.constant 0 : i32
    %c0_i32_23 = arith.constant 0 : i32
    %10 = tpu.memref_slice %arg2[%c0_i32_22, %c0_i32_23] : memref<64x128xf32, #tpu.memory_space<any>> -> memref<64x128xf32, #tpu.memory_space<any>>
    %c64_i32_24 = arith.constant 64 : i32
    %c0_i32_25 = arith.constant 0 : i32
    %11 = tpu.memref_slice %arg3[%c64_i32_24, %c0_i32_25] : memref<256x128xf32, #tpu.memory_space<vmem>> -> memref<64x128xf32, #tpu.memory_space<vmem>>
    %12 = tpu.memref_slice %arg4[%c1_i32_21] : memref<2x!tpu.dma_semaphore, #tpu.memory_space<semaphore_mem>> -> memref<1x!tpu.dma_semaphore, #tpu.memory_space<semaphore_mem>>
    %13 = tpu.memref_squeeze %12 : memref<1x!tpu.dma_semaphore, #tpu.memory_space<semaphore_mem>> -> memref<!tpu.dma_semaphore, #tpu.memory_space<semaphore_mem>>
    tpu.wait_dma2 semaphore(%13 : memref<!tpu.dma_semaphore, #tpu.memory_space<semaphore_mem>>) src(%10 : memref<64x128xf32, #tpu.memory_space<any>>) dst(%11 : memref<64x128xf32, #tpu.memory_space<vmem>>)
    %c0_i32_26 = arith.constant 0 : i32
    %c64_i32_27 = arith.constant 64 : i32
    %14 = arith.addi %c0_i32_26, %c64_i32_27 : i32
    %c1_i32_28 = arith.constant 1 : i32
    scf.for %arg5 = %c0_i32_26 to %14 step %c1_i32_28  : i32 {
      %c64_i32_51 = arith.constant 64 : i32
      %26 = arith.addi %c64_i32_51, %arg5 : i32
      %27 = arith.addi %0, %26 : i32
      %28 = arith.index_cast %27 : i32 to index
      %29 = memref.load %arg1[%28] : memref<256xi32, #tpu.memory_space<smem>>
      %c0_i32_52 = arith.constant 0 : i32
      %30 = arith.cmpi slt, %29, %c0_i32_52 : i32
      %c64_i32_53 = arith.constant 64 : i32
      %31 = arith.cmpi sge, %29, %c64_i32_53 : i32
      %32 = arith.ori %30, %31 : i1
      %33 = arith.extui %32 : i1 to i32
      %c0_i32_54 = arith.constant 0 : i32
      %34 = arith.cmpi ne, %33, %c0_i32_54 : i32
      scf.if %34 {
        %35 = arith.index_cast %26 : i32 to index
        %c0 = arith.constant 0 : index
        %36 = vector.load %arg3[%35, %c0] : memref<256x128xf32, #tpu.memory_space<vmem>>, vector<1x128xf32>
        tpu.vector_store %arg3[%35, %c0], %1 {strides = array<i32>} : memref<256x128xf32, #tpu.memory_space<vmem>>, vector<1x128xf32>,
      } else {
      }
    }
    %c64_i32_29 = arith.constant 64 : i32
    %c1_i32_30 = arith.constant 1 : i32
    %c0_i32_31 = arith.constant 0 : i32
    %c64_i32_32 = arith.constant 64 : i32
    %15 = arith.addi %c0_i32_31, %c64_i32_32 : i32
    %c1_i32_33 = arith.constant 1 : i32
    scf.for %arg5 = %c0_i32_31 to %15 step %c1_i32_33  : i32 {
      %c192_i32_51 = arith.constant 192 : i32
      %26 = arith.addi %c192_i32_51, %arg5 : i32
      %27 = arith.addi %0, %26 : i32
      %28 = arith.index_cast %27 : i32 to index
      %29 = memref.load %arg1[%28] : memref<256xi32, #tpu.memory_space<smem>>
      %c0_i32_52 = arith.constant 0 : i32
      %30 = arith.cmpi sge, %29, %c0_i32_52 : i32
      %c64_i32_53 = arith.constant 64 : i32
      %31 = arith.cmpi slt, %29, %c64_i32_53 : i32
      %32 = arith.andi %30, %31 : i1
      %c0_i32_54 = arith.constant 0 : i32
      %33 = arith.select %32, %29, %c0_i32_54 : i32
      %c0_i32_55 = arith.constant 0 : i32
      %34 = tpu.memref_slice %arg2[%33, %c0_i32_55] : memref<64x128xf32, #tpu.memory_space<any>> -> memref<1x128xf32, #tpu.memory_space<any>>
      %c0_i32_56 = arith.constant 0 : i32
      %35 = tpu.memref_slice %arg3[%26, %c0_i32_56] : memref<256x128xf32, #tpu.memory_space<vmem>> -> memref<1x128xf32, #tpu.memory_space<vmem>>
      %36 = tpu.memref_slice %arg4[%c1_i32_30] : memref<2x!tpu.dma_semaphore, #tpu.memory_space<semaphore_mem>> -> memref<1x!tpu.dma_semaphore, #tpu.memory_space<semaphore_mem>>
      %37 = tpu.memref_squeeze %36 : memref<1x!tpu.dma_semaphore, #tpu.memory_space<semaphore_mem>> -> memref<!tpu.dma_semaphore, #tpu.memory_space<semaphore_mem>>
      tpu.enqueue_dma source(%34 : memref<1x128xf32, #tpu.memory_space<any>>) target(%35 : memref<1x128xf32, #tpu.memory_space<vmem>>) target_semaphore(%37 : memref<!tpu.dma_semaphore, #tpu.memory_space<semaphore_mem>>)
    }
    %c64_i32_34 = arith.constant 64 : i32
    %c0_i32_35 = arith.constant 0 : i32
    %c0_i32_36 = arith.constant 0 : i32
    %c0_i32_37 = arith.constant 0 : i32
    %16 = tpu.memref_slice %arg2[%c0_i32_36, %c0_i32_37] : memref<64x128xf32, #tpu.memory_space<any>> -> memref<64x128xf32, #tpu.memory_space<any>>
    %c128_i32 = arith.constant 128 : i32
    %c0_i32_38 = arith.constant 0 : i32
    %17 = tpu.memref_slice %arg3[%c128_i32, %c0_i32_38] : memref<256x128xf32, #tpu.memory_space<vmem>> -> memref<64x128xf32, #tpu.memory_space<vmem>>
    %18 = tpu.memref_slice %arg4[%c0_i32_35] : memref<2x!tpu.dma_semaphore, #tpu.memory_space<semaphore_mem>> -> memref<1x!tpu.dma_semaphore, #tpu.memory_space<semaphore_mem>>
    %19 = tpu.memref_squeeze %18 : memref<1x!tpu.dma_semaphore, #tpu.memory_space<semaphore_mem>> -> memref<!tpu.dma_semaphore, #tpu.memory_space<semaphore_mem>>
    tpu.wait_dma2 semaphore(%19 : memref<!tpu.dma_semaphore, #tpu.memory_space<semaphore_mem>>) src(%16 : memref<64x128xf32, #tpu.memory_space<any>>) dst(%17 : memref<64x128xf32, #tpu.memory_space<vmem>>)
    %c0_i32_39 = arith.constant 0 : i32
    %c64_i32_40 = arith.constant 64 : i32
    %20 = arith.addi %c0_i32_39, %c64_i32_40 : i32
    %c1_i32_41 = arith.constant 1 : i32
    scf.for %arg5 = %c0_i32_39 to %20 step %c1_i32_41  : i32 {
      %c128_i32_51 = arith.constant 128 : i32
      %26 = arith.addi %c128_i32_51, %arg5 : i32
      %27 = arith.addi %0, %26 : i32
      %28 = arith.index_cast %27 : i32 to index
      %29 = memref.load %arg1[%28] : memref<256xi32, #tpu.memory_space<smem>>
      %c0_i32_52 = arith.constant 0 : i32
      %30 = arith.cmpi slt, %29, %c0_i32_52 : i32
      %c64_i32_53 = arith.constant 64 : i32
      %31 = arith.cmpi sge, %29, %c64_i32_53 : i32
      %32 = arith.ori %30, %31 : i1
      %33 = arith.extui %32 : i1 to i32
      %c0_i32_54 = arith.constant 0 : i32
      %34 = arith.cmpi ne, %33, %c0_i32_54 : i32
      scf.if %34 {
        %35 = arith.index_cast %26 : i32 to index
        %c0 = arith.constant 0 : index
        %36 = vector.load %arg3[%35, %c0] : memref<256x128xf32, #tpu.memory_space<vmem>>, vector<1x128xf32>
        tpu.vector_store %arg3[%35, %c0], %1 {strides = array<i32>} : memref<256x128xf32, #tpu.memory_space<vmem>>, vector<1x128xf32>,
      } else {
      }
    }
    %c64_i32_42 = arith.constant 64 : i32
    %c1_i32_43 = arith.constant 1 : i32
    %c0_i32_44 = arith.constant 0 : i32
    %c0_i32_45 = arith.constant 0 : i32
    %21 = tpu.memref_slice %arg2[%c0_i32_44, %c0_i32_45] : memref<64x128xf32, #tpu.memory_space<any>> -> memref<64x128xf32, #tpu.memory_space<any>>
    %c192_i32 = arith.constant 192 : i32
    %c0_i32_46 = arith.constant 0 : i32
    %22 = tpu.memref_slice %arg3[%c192_i32, %c0_i32_46] : memref<256x128xf32, #tpu.memory_space<vmem>> -> memref<64x128xf32, #tpu.memory_space<vmem>>
    %23 = tpu.memref_slice %arg4[%c1_i32_43] : memref<2x!tpu.dma_semaphore, #tpu.memory_space<semaphore_mem>> -> memref<1x!tpu.dma_semaphore, #tpu.memory_space<semaphore_mem>>
    %24 = tpu.memref_squeeze %23 : memref<1x!tpu.dma_semaphore, #tpu.memory_space<semaphore_mem>> -> memref<!tpu.dma_semaphore, #tpu.memory_space<semaphore_mem>>
    tpu.wait_dma2 semaphore(%24 : memref<!tpu.dma_semaphore, #tpu.memory_space<semaphore_mem>>) src(%21 : memref<64x128xf32, #tpu.memory_space<any>>) dst(%22 : memref<64x128xf32, #tpu.memory_space<vmem>>)
    %c0_i32_47 = arith.constant 0 : i32
    %c64_i32_48 = arith.constant 64 : i32
    %25 = arith.addi %c0_i32_47, %c64_i32_48 : i32
    %c1_i32_49 = arith.constant 1 : i32
    scf.for %arg5 = %c0_i32_47 to %25 step %c1_i32_49  : i32 {
      %c192_i32_51 = arith.constant 192 : i32
      %26 = arith.addi %c192_i32_51, %arg5 : i32
      %27 = arith.addi %0, %26 : i32
      %28 = arith.index_cast %27 : i32 to index
      %29 = memref.load %arg1[%28] : memref<256xi32, #tpu.memory_space<smem>>
      %c0_i32_52 = arith.constant 0 : i32
      %30 = arith.cmpi slt, %29, %c0_i32_52 : i32
      %c64_i32_53 = arith.constant 64 : i32
      %31 = arith.cmpi sge, %29, %c64_i32_53 : i32
      %32 = arith.ori %30, %31 : i1
      %33 = arith.extui %32 : i1 to i32
      %c0_i32_54 = arith.constant 0 : i32
      %34 = arith.cmpi ne, %33, %c0_i32_54 : i32
      scf.if %34 {
        %35 = arith.index_cast %26 : i32 to index
        %c0 = arith.constant 0 : index
        %36 = vector.load %arg3[%35, %c0] : memref<256x128xf32, #tpu.memory_space<vmem>>, vector<1x128xf32>
        tpu.vector_store %arg3[%35, %c0], %1 {strides = array<i32>} : memref<256x128xf32, #tpu.memory_space<vmem>>, vector<1x128xf32>,
      } else {
      }
    }
    %c64_i32_50 = arith.constant 64 : i32
    return
  }
  func.func @transform_1(%arg0: i32, %arg1: memref<256xi32, #tpu.memory_space<smem>>) -> (i32, i32) {
    %c0_i32 = arith.constant 0 : i32
    %c0_i32_0 = arith.constant 0 : i32
    return %arg0, %c0_i32 : i32, i32
  }
}

</mosaic_0001>

<bundles_post_ra>
// kernel: tpu_custom_call.1
= control target key start
LH: loop header
LB: loop body
LE: loop exit
PB: predicated region body
PF: predicated region fallthrough
CT: control target
= control target key end

     0   :  { %s722_s0 = inlined_call_operand.hbm [shape: s32[256], index: 0, kind: input, shape index: {}]   ;;  %s723_s1 = inlined_call_operand.hbm [shape: f32[64,128], index: 1, kind: input, shape index: {}]   ;;  %s724_s2 = inlined_call_operand.hbm [shape: f32[256,128], index: 2, kind: output, shape index: {}]  }
   0x1   :  { %s378_s11 = scalar_lea.hbm %s722_s0, 32 }
   0x2   :  { %p379_p0 = scmp.ne.s32.totalorder %s722_s0, %s378_s11  ;;  %p382_p1 = scmp.lt.u32.totalorder %s378_s11, %s722_s0 }
   0x4   :  { %p384_p2 = pnand %p382_p1, %p379_p0 }
   0x6   :  { %387 = shalt.err (!%p384_p2)  }
   0x7   :  { %s582_s16 = smov [#allocation4]  }
   0x8   :  { %8 = dma.hbm_to_smem %s722_s0, 32, %s582_s16, [#allocation3] }
   0x9   :  { %538 = dma.done.wait [#allocation3], 32 }
   0xa   :  { %539 = vsyncadd [#allocation3], 4294967264 }
   0xb   :  { %10 = sfence }
   0xc   :  { %11 = vsyncpa [#allocation6], 0  ;;  %s617_s19 = smov 0  }
   0xd LB: > { %s20_s20 = sld [smem:[#allocation4 + %s552_s19]]  ;;  %s28_s21 = scalar_lea.vmem [#allocation5], %s552_s19  ;;  %s552_s19 = sphi %s617_s19, %s18_s19  }
   0xe   : > { %s36_s22 = sshll.u32 %s28_s21, 4  ;;  %s630_s29 = scalar_lea.hbm %s723_s1, 1024  ;;  %s37_s22 = int_to_ptr.vmem [resolvable:$true] %s36_s22 }
  0x13   : > { %p21_p3 = scmp.ge.s32.totalorder %s20_s20, 0  ;;  %p22_p4 = scmp.lt.s32.totalorder %s20_s20, 64 }
  0x15   : > { %p23_p5 = pnand %p22_p4, %p21_p3 }
  0x17   : > { %s726_s20 = smov (%p23_p5, %s20_s20), 0 }
  0x18   : > { %s294_s0 = sshll.u32 %s726_s20, 4 }
  0x19   : > { %s27_s25 = scalar_lea.hbm %s723_s1, %s294_s0 }
  0x1a   : > { %s388_s26 = scalar_lea.hbm %s27_s25, 16  ;;  %p391_p7 = scmp.lt.u32.totalorder %s27_s25, %s723_s1 }
  0x1b   : > { %p389_p6 = scmp.ne.s32.totalorder %s27_s25, %s388_s26  ;;  %p392_p8 = scmp.lt.u32.totalorder %s630_s29, %s388_s26 }
  0x1c   : > { %p394_p10 = scmp.lt.u32.totalorder %s388_s26, %s27_s25 }
  0x1d   : > { %p393_p9 = por %p392_p8, %p391_p7 }
  0x1f   : > { %p395_p11 = por %p394_p10, %p393_p9 }
  0x21   : > { %p396_p12 = pnand %p395_p11, %p389_p6 }
  0x23   : > { %399 = shalt.err (!%p396_p12)  }
  0x24   : > { %s400_s4 = scalar_lea.vmem %s37_s22, 16  ;;  %s583_s5 = smov [#allocation5]  }
  0x25   : > { %p401_p13 = scmp.ne.s32.totalorder %s37_s22, %s400_s4  ;;  %s402_s6 = sshll.u32 %s583_s5, 4  ;;  %s636_s6 = int_to_ptr.vmem [resolvable:$false] %s402_s6 }
  0x26   : > { %s639_s7 = scalar_lea.vmem %s636_s6, 4096  ;;  %p405_p0 = scmp.lt.s32.totalorder %s37_s22, %s636_s6 }
  0x27   : > { %p406_p1 = scmp.lt.s32.totalorder %s639_s7, %s400_s4 }
  0x29   : > { %p407_p2 = por %p406_p1, %p405_p0 }
  0x2b   : > { %p408_p3 = pnand %p407_p2, %p401_p13 }
  0x2d   : > { %411 = shalt.err (!%p408_p3)  }
  0x2e   : > { %39 = dma.hbm_to_vmem [thread:$0]  %s27_s25, 16, %s37_s22, [#allocation2] }
  0x2f   : > { %s18_s19 = sadd.s32 1, %s552_s19  }
  0x30   : > { %p15_p4 = scmp.ge.s32.totalorder %s18_s19, 64  }
  0x31   :  { %s646_s8 = smov (%p15_p4), 0  }
  0x32   :  { %17 = sbr.rel (!%p15_p4) target bundleno = 13 (0xd), region = 123 }
  0x39 LB: > { %s46_s9 = sadd.s32 64, %s556_s8  ;;  %s236_s11 = scalar_lea.vmem [#allocation5], %s556_s8  ;;  %s556_s8 = sphi %s646_s8, %s45_s8  }
  0x3a   : > { %s48_s10 = sld [smem:[#allocation4 + %s46_s9]]  ;;  %s237_s12 = scalar_lea.vmem %s236_s11, 64 [#allocation5] }
  0x3b   : > { %s65_s13 = sshll.u32 %s237_s12, 4  ;;  %s66_s13 = int_to_ptr.vmem [resolvable:$true] %s65_s13 }
  0x40   : > { %p49_p5 = scmp.ge.s32.totalorder %s48_s10, 0  ;;  %p50_p6 = scmp.lt.s32.totalorder %s48_s10, 64 }
  0x42   : > { %p51_p7 = pnand %p50_p6, %p49_p5 }
  0x44   : > { %s728_s10 = smov (%p51_p7, %s48_s10), 0 }
  0x45   : > { %s296_s14 = sshll.u32 %s728_s10, 4 }
  0x46   : > { %s55_s17 = scalar_lea.hbm %s723_s1, %s296_s14 }
  0x47   : > { %s412_s18 = scalar_lea.hbm %s55_s17, 16  ;;  %p415_p9 = scmp.lt.u32.totalorder %s55_s17, %s723_s1 }
  0x48   : > { %p413_p8 = scmp.ne.s32.totalorder %s55_s17, %s412_s18  ;;  %p416_p10 = scmp.lt.u32.totalorder %s630_s29, %s412_s18 }
  0x49   : > { %p418_p12 = scmp.lt.u32.totalorder %s412_s18, %s55_s17 }
  0x4a   : > { %p417_p11 = por %p416_p10, %p415_p9 }
  0x4c   : > { %p419_p13 = por %p418_p12, %p417_p11 }
  0x4e   : > { %p420_p0 = pnand %p419_p13, %p413_p8 }
  0x50   : > { %423 = shalt.err (!%p420_p0)  }
  0x51   : > { %s424_s21 = scalar_lea.vmem %s66_s13, 16  ;;  %p429_p2 = scmp.lt.s32.totalorder %s66_s13, %s636_s6 }
  0x52   : > { %p425_p1 = scmp.ne.s32.totalorder %s66_s13, %s424_s21  ;;  %p430_p3 = scmp.lt.s32.totalorder %s639_s7, %s424_s21 }
  0x54   : > { %p431_p4 = por %p430_p3, %p429_p2 }
  0x56   : > { %p432_p5 = pnand %p431_p4, %p425_p1 }
  0x58   : > { %435 = shalt.err (!%p432_p5)  }
  0x59   : > { %68 = dma.hbm_to_vmem [thread:$0]  %s55_s17, 16, %s66_s13, [#allocation2 + $0x1] }
  0x5a   : > { %s45_s8 = sadd.s32 1, %s556_s8  }
  0x5b   : > { %p42_p6 = scmp.ge.s32.totalorder %s45_s8, 64  }
  0x5d   :  { %44 = sbr.rel (!%p42_p6) target bundleno = 57 (0x39), region = 134 }
  0x64   :  { %540 = dma.done.wait [#allocation2], 1024 }
  0x65   :  { %541 = vsyncadd [#allocation2], 4294966272  ;;  %s558_s22 = smov 0  }
  0x66 LB: > { %s79_s0 = sld [smem:[#allocation4 + %s560_s22]]  ;;  %s560_s22 = sphi %s558_s22, %s77_s22  }
  0x6c   : > { %p80_p7 = scmp.lt.s32.totalorder %s79_s0, 0  ;;  %p81_p8 = scmp.ge.s32.totalorder %s79_s0, 64 }
  0x6e   : > { %p82_p9 = por %p81_p8, %p80_p7 }
  0x6f   : > { %s86_s23 = scalar_lea.vmem (%p82_p9), [#allocation5], %s560_s22  ;;  %v584_v0 = vmov (%p82_p9), 0.0  }
  0x70   : > { %85 = sbr.rel (!%p82_p9) target bundleno = 119 (0x77), region = 34  ;;  %87 = vst [vmem:[%s86_s23] sm:$0x1] (%p82_p9), %v584_v0 }
  0x77 PF: > { %s77_s22 = sadd.s32 1, %s560_s22  }
  0x78   : > { %p74_p10 = scmp.ge.s32.totalorder %s77_s22, 64  }
  0x79   :  { %s665_s24 = smov (%p74_p10), 0  }
  0x7a   :  { %76 = sbr.rel (!%p74_p10) target bundleno = 102 (0x66), region = 145 }
  0x81 LB: > { %s94_s25 = sadd.s32 128, %s564_s24  ;;  %s241_s27 = scalar_lea.vmem [#allocation5], %s564_s24  ;;  %s564_s24 = sphi %s665_s24, %s93_s24  }
  0x82   : > { %s96_s26 = sld [smem:[#allocation4 + %s94_s25]]  ;;  %s242_s28 = scalar_lea.vmem %s241_s27, 128 [#allocation5] }
  0x83   : > { %s112_s30 = sshll.u32 %s242_s28, 4  ;;  %s113_s30 = int_to_ptr.vmem [resolvable:$true] %s112_s30 }
  0x88   : > { %p97_p11 = scmp.ge.s32.totalorder %s96_s26, 0  ;;  %p98_p12 = scmp.lt.s32.totalorder %s96_s26, 64 }
  0x8a   : > { %p99_p13 = pnand %p98_p12, %p97_p11 }
  0x8c   : > { %s730_s26 = smov (%p99_p13, %s96_s26), 0 }
  0x8d   : > { %s298_s3 = sshll.u32 %s730_s26, 4 }
  0x8e   : > { %s103_s8 = scalar_lea.hbm %s723_s1, %s298_s3 }
  0x8f   : > { %s436_s9 = scalar_lea.hbm %s103_s8, 16  ;;  %p439_p1 = scmp.lt.u32.totalorder %s103_s8, %s723_s1 }
  0x90   : > { %p437_p0 = scmp.ne.s32.totalorder %s103_s8, %s436_s9  ;;  %p440_p2 = scmp.lt.u32.totalorder %s630_s29, %s436_s9 }
  0x91   : > { %p442_p4 = scmp.lt.u32.totalorder %s436_s9, %s103_s8 }
  0x92   : > { %p441_p3 = por %p440_p2, %p439_p1 }
  0x94   : > { %p443_p5 = por %p442_p4, %p441_p3 }
  0x96   : > { %p444_p6 = pnand %p443_p5, %p437_p0 }
  0x98   : > { %447 = shalt.err (!%p444_p6)  }
  0x99   : > { %s448_s12 = scalar_lea.vmem %s113_s30, 16  ;;  %p453_p8 = scmp.lt.s32.totalorder %s113_s30, %s636_s6 }
  0x9a   : > { %p449_p7 = scmp.ne.s32.totalorder %s113_s30, %s448_s12  ;;  %p454_p9 = scmp.lt.s32.totalorder %s639_s7, %s448_s12 }
  0x9c   : > { %p455_p10 = por %p454_p9, %p453_p8 }
  0x9e   : > { %p456_p11 = pnand %p455_p10, %p449_p7 }
  0xa0   : > { %459 = shalt.err (!%p456_p11)  }
  0xa1   : > { %115 = dma.hbm_to_vmem [thread:$0]  %s103_s8, 16, %s113_s30, [#allocation2] }
  0xa2   : > { %s93_s24 = sadd.s32 1, %s564_s24  }
  0xa3   : > { %p90_p12 = scmp.ge.s32.totalorder %s93_s24, 64  }
  0xa5   :  { %92 = sbr.rel (!%p90_p12) target bundleno = 129 (0x81), region = 156 }
  0xac   :  { %542 = dma.done.wait [#allocation2 + $0x1], 1024 }
  0xad   :  { %543 = vsyncadd [#allocation2 + $0x1], 4294966272  ;;  %s566_s13 = smov 0  }
  0xae LB: > { %s125_s14 = sadd.s32 64, %s568_s13  ;;  %s568_s13 = sphi %s566_s13, %s124_s13  }
  0xaf   : > { %s127_s15 = sld [smem:[#allocation4 + %s125_s14]] }
  0xb5   : > { %p128_p13 = scmp.lt.s32.totalorder %s127_s15, 0  ;;  %p129_p0 = scmp.ge.s32.totalorder %s127_s15, 64 }
  0xb7   : > { %p130_p1 = por %p129_p0, %p128_p13 }
  0xb8   : > { %s243_s16 = scalar_lea.vmem (%p130_p1), [#allocation5], %s568_s13  ;;  %v585_v1 = vmov (%p130_p1), 0.0  }
  0xb9   : > { %133 = sbr.rel (!%p130_p1) target bundleno = 192 (0xc0), region = 56  ;;  %299 = vst [vmem:[%s243_s16 + $0x40] sm:$0x1] (%p130_p1), %v585_v1 }
  0xc0 PF: > { %s124_s13 = sadd.s32 1, %s568_s13  }
  0xc1   : > { %p121_p2 = scmp.ge.s32.totalorder %s124_s13, 64  }
  0xc2   :  { %s684_s17 = smov (%p121_p2), 0  }
  0xc3   :  { %123 = sbr.rel (!%p121_p2) target bundleno = 174 (0xae), region = 167 }
  0xca LB: > { %s142_s18 = sadd.s32 192, %s572_s17  ;;  %s247_s20 = scalar_lea.vmem [#allocation5], %s572_s17  ;;  %s572_s17 = sphi %s684_s17, %s141_s17  }
  0xcb   : > { %s144_s19 = sld [smem:[#allocation4 + %s142_s18]]  ;;  %s248_s21 = scalar_lea.vmem %s247_s20, 192 [#allocation5] }
  0xcc   : > { %s160_s22 = sshll.u32 %s248_s21, 4  ;;  %s161_s22 = int_to_ptr.vmem [resolvable:$true] %s160_s22 }
  0xd1   : > { %p145_p3 = scmp.ge.s32.totalorder %s144_s19, 0  ;;  %p146_p4 = scmp.lt.s32.totalorder %s144_s19, 64 }
  0xd3   : > { %p147_p5 = pnand %p146_p4, %p145_p3 }
  0xd5   : > { %s732_s19 = smov (%p147_p5, %s144_s19), 0 }
  0xd6   : > { %s301_s0 = sshll.u32 %s732_s19, 4 }
  0xd7   : > { %s151_s25 = scalar_lea.hbm %s723_s1, %s301_s0 }
  0xd8   : > { %s460_s26 = scalar_lea.hbm %s151_s25, 16  ;;  %p463_p7 = scmp.lt.u32.totalorder %s151_s25, %s723_s1 }
  0xd9   : > { %p461_p6 = scmp.ne.s32.totalorder %s151_s25, %s460_s26  ;;  %p464_p8 = scmp.lt.u32.totalorder %s630_s29, %s460_s26 }
  0xda   : > { %p466_p10 = scmp.lt.u32.totalorder %s460_s26, %s151_s25 }
  0xdb   : > { %p465_p9 = por %p464_p8, %p463_p7 }
  0xdd   : > { %p467_p11 = por %p466_p10, %p465_p9 }
  0xdf   : > { %p468_p12 = pnand %p467_p11, %p461_p6 }
  0xe1   : > { %471 = shalt.err (!%p468_p12)  }
  0xe2   : > { %s472_s30 = scalar_lea.vmem %s161_s22, 16  ;;  %p477_p0 = scmp.lt.s32.totalorder %s161_s22, %s636_s6 }
  0xe3   : > { %p473_p13 = scmp.ne.s32.totalorder %s161_s22, %s472_s30  ;;  %p478_p1 = scmp.lt.s32.totalorder %s639_s7, %s472_s30 }
  0xe5   : > { %p479_p2 = por %p478_p1, %p477_p0 }
  0xe7   : > { %p480_p3 = pnand %p479_p2, %p473_p13 }
  0xe9   : > { %483 = shalt.err (!%p480_p3)  }
  0xea   : > { %163 = dma.hbm_to_vmem [thread:$0]  %s151_s25, 16, %s161_s22, [#allocation2 + $0x1] }
  0xeb   : > { %s141_s17 = sadd.s32 1, %s572_s17  }
  0xec   : > { %p138_p4 = scmp.ge.s32.totalorder %s141_s17, 64  }
  0xee   :  { %140 = sbr.rel (!%p138_p4) target bundleno = 202 (0xca), region = 178 }
  0xf5   :  { %544 = dma.done.wait [#allocation2], 1024 }
  0xf6   :  { %545 = vsyncadd [#allocation2], 4294966272  ;;  %s574_s3 = smov 0  }
  0xf7 LB: > { %s172_s4 = sadd.s32 128, %s576_s3  ;;  %s576_s3 = sphi %s574_s3, %s171_s3  }
  0xf8   : > { %s174_s5 = sld [smem:[#allocation4 + %s172_s4]] }
  0xfe   : > { %p175_p5 = scmp.lt.s32.totalorder %s174_s5, 0  ;;  %p176_p6 = scmp.ge.s32.totalorder %s174_s5, 64 }
 0x100   : > { %p177_p7 = por %p176_p6, %p175_p5 }
 0x101   : > { %s249_s8 = scalar_lea.vmem (%p177_p7), [#allocation5], %s576_s3  ;;  %v586_v2 = vmov (%p177_p7), 0.0  }
 0x102   : > { %180 = sbr.rel (!%p177_p7) target bundleno = 265 (0x109), region = 78  ;;  %302 = vst [vmem:[%s249_s8 + $0x80] sm:$0x1] (%p177_p7), %v586_v2 }
 0x109 PF: > { %s171_s3 = sadd.s32 1, %s576_s3  }
 0x10a   : > { %p168_p8 = scmp.ge.s32.totalorder %s171_s3, 64  }
 0x10c   :  { %170 = sbr.rel (!%p168_p8) target bundleno = 247 (0xf7), region = 189 }
 0x113   :  { %546 = dma.done.wait [#allocation2 + $0x1], 1024 }
 0x114   :  { %547 = vsyncadd [#allocation2 + $0x1], 4294966272  ;;  %s578_s1 = smov 0  }
 0x115 LB: > { %s191_s29 = sadd.s32 192, %s580_s1  ;;  %s580_s1 = sphi %s578_s1, %s190_s1  }
 0x116   : > { %s193_s9 = sld [smem:[#allocation4 + %s191_s29]] }
 0x11c   : > { %p194_p9 = scmp.lt.s32.totalorder %s193_s9, 0  ;;  %p195_p10 = scmp.ge.s32.totalorder %s193_s9, 64 }
 0x11e   : > { %p196_p11 = por %p195_p10, %p194_p9 }
 0x11f   : > { %s251_s10 = scalar_lea.vmem (%p196_p11), [#allocation5], %s580_s1  ;;  %v587_v3 = vmov (%p196_p11), 0.0  }
 0x120   : > { %199 = sbr.rel (!%p196_p11) target bundleno = 295 (0x127), region = 89  ;;  %303 = vst [vmem:[%s251_s10 + $0xc0] sm:$0x1] (%p196_p11), %v587_v3 }
 0x127 PF: > { %s190_s1 = sadd.s32 1, %s580_s1  }
 0x128   : > { %p187_p12 = scmp.ge.s32.totalorder %s190_s1, 64  }
 0x129   :  { %p485_p13 = scmp.ne.s32.totalorder (%p187_p12), %s636_s6, %s639_s7  ;;  %p489_p0 = scmp.lt.s32.totalorder (%p187_p12), %s636_s6, %s636_s6 }
 0x12a   :  { %189 = sbr.rel (!%p187_p12) target bundleno = 277 (0x115), region = 200  ;;  %p490_p1 = scmp.lt.s32.totalorder (%p187_p12), %s639_s7, %s639_s7 }
 0x12c   :  { %p491_p2 = por (%p187_p12), %p490_p1, %p489_p0 }
 0x12e   :  { %p492_p3 = pnand (%p187_p12), %p491_p2, %p485_p13 }
 0x131   :  { %495 = shalt.err (!%p492_p3)
}
 0x132   :  { %s496_s13 = scalar_lea.hbm %s724_s2, 4096 }
 0x133   :  { %p497_p4 = scmp.ne.s32.totalorder %s724_s2, %s496_s13  ;;  %p500_p5 = scmp.lt.u32.totalorder %s496_s13, %s724_s2 }
 0x135   :  { %p502_p6 = pnand %p500_p5, %p497_p4 }
 0x137   :  { %505 = shalt.err (!%p502_p6)
}
 0x138   :  { %s588_s18 = smov 128   ;;  %s589_s7 = smov 8  }
 0x139   :  { %213 = dma.vmem_to_hbm [thread:$0]  %s636_s6, 4096, %s724_s2, [#allocation6], %s588_s18, %s588_s18, %s589_s7  }
 0x13a   :  { %548 = dma.done.wait [#allocation6], 4096  }
 0x13b   :  { %549 = vsyncadd [#allocation6], 4294963200 }
 0x13c   :  { %217 = vsyncpa [#allocation6], 1 }
 0x13d   :  { %218 = vsyncmov [#allocation2] }
 0x140   :  { %s219_s21 = vpop.sfrf %218 }
 0x141   :  { %p304_p7 = scmp.ne.s32.totalorder %s219_s21, 0 }
 0x143   :  { %223 = shalt.err (%p304_p7)  }
 0x144   :  { %225 = vsyncmov [#allocation2 + $0x1] }
 0x147   :  { %s226_s22 = vpop.sfrf %225 }
 0x148   :  { %p305_p8 = scmp.ne.s32.totalorder %s226_s22, 0 }
 0x14a   :  { %230 = shalt.err (%p305_p8)  }

</bundles_post_ra>
